<compile_context>
chip_gen: v5e
topology: v5e:2x2
jax: 0.10.0
libtpu: 0.0.40
codegen_flags: <defaults>
</compile_context>

<pallas_src>
import functools

import jax
import jax.numpy as jnp
import numpy as np
from jax.experimental import pallas as pl
from jax.experimental.pallas import tpu as pltpu

_LANE = 128          # lane width: hidden feature dims pad to this
_ROW_ALIGN = 16      # bf16 packed sublane tile: row-align weight-slab chunks
_MXU_ROWS = 256      # v6e/v7x MXU is 2x256^2


def _round_up(x, m):
    return ((x + m - 1) // m) * m


# ----------------------------------------------------------------------------
# Kernel: the whole MLP for one M-tile.  Operands: x, weight slab, bias slab.
# ----------------------------------------------------------------------------
def _fused_mlp_kernel(x_ref, w_ref, b_ref, o_ref, *,
                      row_spans, relu_flags, out_dims):
    h = x_ref[...]                                        # (tm, K0)  f32
    for l, (r0, r1) in enumerate(row_spans):
        w = w_ref[pl.ds(r0, r1 - r0), :]                  # (in_pad, n_max) bf16
        b = b_ref[l:l + 1, :]                             # (1, n_max)      f32
        # bf16 MXU matmul with f32 accumulation; bias + ReLU epilogue in f32.
        h = jnp.dot(h.astype(w.dtype), w,
                    preferred_element_type=jnp.float32) + b
        if relu_flags[l]:
            h = jnp.maximum(h, 0.0)
    # Unpadded store: out_dims is the full last dim of the output array, so
    # this block shape is legal and HBM write bytes drop 8x vs padded output.
    o_ref[...] = h[:, :out_dims].astype(o_ref.dtype)


def fused_mlp(x, w_slab, b_slab, row_spans, relu_flags, out_dims, *,
              tm_max=2048):
    """Runs the whole MLP in one pallas_call.

    x:       (M, K0) f32 activations.
    w_slab:  (sum_l in_pad_l, n_max) bf16 — all folded/padded weights stacked.
    b_slab:  (num_layers, n_max) f32 — all folded/padded biases.
    Returns the (M, out_dims) output (unpadded).
    """
    M, K0 = x.shape
    k_in = row_spans[0][1] - row_spans[0][0]
    if k_in != K0:                      # row-align first slab chunk (no-op at K0=32)
        x = jnp.pad(x, ((0, 0), (0, k_in - K0)))

    # Batch tiling: single block at small M; big tiles (low per-step overhead)
    # at large M, but capped so v7x's two TensorCores both get work.
    tm = min(tm_max, _round_up(M, 8))
    if M >= 2 * _MXU_ROWS:
        tm = min(tm, _round_up(-(-M // 2), _MXU_ROWS))    # >=2 steps, 256-aligned
    m_pad = _round_up(M, tm)
    if m_pad != M:
        x = jnp.pad(x, ((0, m_pad - M), (0, 0)))
    grid = (m_pad // tm,)

    n_max = w_slab.shape[1]
    flops = 2 * m_pad * w_slab.shape[0] * n_max
    bytes_accessed = (x.size * x.dtype.itemsize
                      + w_slab.size * w_slab.dtype.itemsize
                      + b_slab.size * b_slab.dtype.itemsize
                      + m_pad * out_dims * x.dtype.itemsize)

    kernel = functools.partial(_fused_mlp_kernel,
                               row_spans=tuple(row_spans),
                               relu_flags=tuple(bool(r) for r in relu_flags),
                               out_dims=out_dims)

    out = pl.pallas_call(
        kernel,
        out_shape=jax.ShapeDtypeStruct((m_pad, out_dims), x.dtype),
        grid=grid,
        in_specs=[
            pl.BlockSpec((tm, k_in), lambda i: (i, 0)),
            pl.BlockSpec(w_slab.shape, lambda i: (0, 0)),   # VMEM-resident slab
            pl.BlockSpec(b_slab.shape, lambda i: (0, 0)),   # VMEM-resident biases
        ],
        out_specs=pl.BlockSpec((tm, out_dims), lambda i: (i, 0)),
        compiler_params=pltpu.CompilerParams(
            dimension_semantics=("parallel",)),
        cost_estimate=pl.CostEstimate(flops=flops, transcendentals=0,
                                      bytes_accessed=bytes_accessed),
    )(x, w_slab, b_slab)
    return out[:M] if m_pad != M else out


# ----------------------------------------------------------------------------
# Parameter construction (deterministic, mirrors nn.Linear / nn.BatchNorm1d)
# ----------------------------------------------------------------------------
def init_mlp_params(key, in_dims, out_dims, hiddens, bn):
    """Raw (unfolded, unpadded) per-layer params for the reference path."""
    layers = []
    dims = [in_dims] + list(hiddens)
    eps = 1e-5
    for inpc, outc in zip(dims[:-1], dims[1:]):
        key, kw, kb = jax.random.split(key, 3)
        bound = 1.0 / np.sqrt(inpc)
        w = jax.random.uniform(kw, (inpc, outc), jnp.float32, -bound, bound)
        b = jax.random.uniform(kb, (outc,), jnp.float32, -bound, bound)
        if bn:
            # BatchNorm1d defaults: gamma=1, beta=0, running_mean=0, running_var=1
            gamma = jnp.ones((outc,), jnp.float32)
            beta = jnp.zeros((outc,), jnp.float32)
            running_mean = jnp.zeros((outc,), jnp.float32)
            running_var = jnp.ones((outc,), jnp.float32)
            scale = gamma / jnp.sqrt(running_var + eps)
            shift = beta - running_mean * scale
        else:
            scale = jnp.ones((outc,), jnp.float32)
            shift = jnp.zeros((outc,), jnp.float32)
        layers.append(dict(w=w, b=b, scale=scale, shift=shift, relu=True))
    # Final linear: dims[-1] -> out_dims (handles hiddens == [] too)
    last_in = dims[-1]
    key, kw, kb = jax.random.split(key, 3)
    bound = 1.0 / np.sqrt(last_in)
    w = jax.random.uniform(kw, (last_in, out_dims), jnp.float32, -bound, bound)
    b = jax.random.uniform(kb, (out_dims,), jnp.float32, -bound, bound)
    layers.append(dict(w=w, b=b,
                       scale=jnp.ones((out_dims,), jnp.float32),
                       shift=jnp.zeros((out_dims,), jnp.float32),
                       relu=False))
    return layers


def fold_and_pad_params(layers, *, compute_dtype=jnp.bfloat16):
    """One-time setup: fold eval-mode BN into (w, b), zero-pad feature dims to
    128 lanes, stack all weights into one bf16 slab and all biases into one
    f32 block.  Padded lanes stay exactly zero (zero weight cols/rows, zero
    padded bias, ReLU(0)=0), so downstream layers are unaffected."""
    n_max = max(_round_up(l["w"].shape[1], _LANE) for l in layers)
    w_chunks, b_rows, relu_flags, row_spans = [], [], [], []
    row = 0
    in_pad = _round_up(layers[0]["w"].shape[0], _ROW_ALIGN)
    for layer in layers:
        w, b = layer["w"], layer["b"]
        scale, shift = layer["scale"], layer["shift"]
        # BN fold: (x@w + b)*scale + shift == x@(w*scale) + (b*scale + shift)
        w_f = w * scale[None, :]
        b_f = b * scale + shift
        inpc, outc = w_f.shape
        w_p = jnp.zeros((in_pad, n_max), jnp.float32).at[:inpc, :outc].set(w_f)
        b_p = jnp.zeros((n_max,), jnp.float32).at[:outc].set(b_f)
        w_chunks.append(w_p)
        b_rows.append(b_p)
        relu_flags.append(layer["relu"])
        row_spans.append((row, row + in_pad))
        row += in_pad
        in_pad = n_max       # next layer consumes the (padded) activation
    w_slab = jnp.concatenate(w_chunks, axis=0).astype(compute_dtype)
    b_slab = jnp.stack(b_rows, axis=0)                # (num_layers, n_max) f32
    return w_slab, b_slab, tuple(row_spans), tuple(relu_flags)


def mlp_reference(x, layers):
    """Pure-JAX f32 reference of the same (eval-mode) forward, unfolded/unpadded."""
    for layer in layers:
        y = x @ layer["w"] + layer["b"]
        y = y * layer["scale"] + layer["shift"]
        if layer["relu"]:
            y = jnp.maximum(y, 0.0)
        x = y
    return x


if __name__ == "__main__":
    in_dims, out_dims, hiddens = 32, 16, [64, 64]
    batch = 8

    key = jax.random.PRNGKey(0)
    key, kx = jax.random.split(key)
    x = jax.random.normal(kx, (batch, in_dims), jnp.float32)

    layers = init_mlp_params(key, in_dims, out_dims, hiddens, bn=True)
    # One-time setup (hoisted out of the hot path).
    w_slab, b_slab, row_spans, relu_flags = fold_and_pad_params(layers)

    out = fused_mlp(x, w_slab, b_slab, row_spans, relu_flags, out_dims)
    out = jax.block_until_ready(out)

    ref = jax.block_until_ready(mlp_reference(x, layers))
    # bf16 matmul inputs vs f32 reference: relaxed tolerance (per review).
    np.testing.assert_allclose(np.asarray(out), np.asarray(ref),
                               rtol=3e-2, atol=3e-2)
    assert out.shape == (batch, out_dims)
    print("KERNEL_OK")
</pallas_src>

<mosaic_0001>
module attributes {stable_mosaic.version = 11 : i64} {
  func.func @_fused_mlp_kernel(%arg0: i32, %arg1: memref<8x32xf32, #tpu.memory_space<vmem>>, %arg2: memref<288x128xbf16, #tpu.memory_space<vmem>>, %arg3: memref<3x128xf32, #tpu.memory_space<vmem>>, %arg4: memref<8x16xf32, #tpu.memory_space<vmem>>) attributes {dimension_semantics = [#tpu.dimension_semantics<parallel>], iteration_bounds = array<i64: 1>, scalar_prefetch = 0 : i64, scratch_operands = 0 : i64, tpu.core_type = #tpu.core_type<tc>, window_params = [{transform_indices = @transform_0, window_bounds = array<i64: 8, 32>}, {pipeline_mode = #tpu.pipeline_mode<synchronous>, transform_indices = @transform_1, window_bounds = array<i64: 288, 128>}, {pipeline_mode = #tpu.pipeline_mode<synchronous>, transform_indices = @transform_2, window_bounds = array<i64: 3, 128>}, {transform_indices = @transform_3, window_bounds = array<i64: 8, 16>}]} {
    %c0 = arith.constant 0 : index
    %c0_0 = arith.constant 0 : index
    %0 = vector.load %arg1[%c0, %c0_0] : memref<8x32xf32, #tpu.memory_space<vmem>>, vector<8x32xf32>
    %c0_1 = arith.constant 0 : index
    %c0_2 = arith.constant 0 : index
    %1 = vector.load %arg2[%c0_1, %c0_2] : memref<288x128xbf16, #tpu.memory_space<vmem>>, vector<32x128xbf16>
    %c0_3 = arith.constant 0 : index
    %c0_4 = arith.constant 0 : index
    %2 = vector.load %arg3[%c0_3, %c0_4] : memref<3x128xf32, #tpu.memory_space<vmem>>, vector<1x128xf32>
    %3 = arith.truncf %0 : vector<8x32xf32> to vector<8x32xbf16>
    %cst = arith.constant dense<0.000000e+00> : vector<8x128xf32>
    %4 = tpu.matmul %3, %1, %cst {dimension_numbers = #tpu.dot_dimension_numbers<[1], [0], [0], [1], [0, 0, 1, 1], [], []>} : vector<8x32xbf16>, vector<32x128xbf16>, vector<8x128xf32> -> vector<8x128xf32>
    %5 = vector.broadcast %2 : vector<1x128xf32> to vector<8x128xf32>
    %6 = arith.addf %4, %5 : vector<8x128xf32>
    %cst_5 = arith.constant 0.000000e+00 : f32
    %7 = vector.broadcast %cst_5 : f32 to vector<8x128xf32>
    %8 = arith.maximumf %6, %7 : vector<8x128xf32>
    %c32 = arith.constant 32 : index
    %c0_6 = arith.constant 0 : index
    %9 = vector.load %arg2[%c32, %c0_6] : memref<288x128xbf16, #tpu.memory_space<vmem>>, vector<128x128xbf16>
    %c1 = arith.constant 1 : index
    %c0_7 = arith.constant 0 : index
    %10 = vector.load %arg3[%c1, %c0_7] : memref<3x128xf32, #tpu.memory_space<vmem>>, vector<1x128xf32>
    %11 = arith.truncf %8 : vector<8x128xf32> to vector<8x128xbf16>
    %cst_8 = arith.constant dense<0.000000e+00> : vector<8x128xf32>
    %12 = tpu.matmul %11, %9, %cst_8 {dimension_numbers = #tpu.dot_dimension_numbers<[1], [0], [0], [1], [0, 0, 1, 1], [], []>} : vector<8x128xbf16>, vector<128x128xbf16>, vector<8x128xf32> -> vector<8x128xf32>
    %13 = vector.broadcast %10 : vector<1x128xf32> to vector<8x128xf32>
    %14 = arith.addf %12, %13 : vector<8x128xf32>
    %cst_9 = arith.constant 0.000000e+00 : f32
    %15 = vector.broadcast %cst_9 : f32 to vector<8x128xf32>
    %16 = arith.maximumf %14, %15 : vector<8x128xf32>
    %c160 = arith.constant 160 : index
    %c0_10 = arith.constant 0 : index
    %17 = vector.load %arg2[%c160, %c0_10] : memref<288x128xbf16, #tpu.memory_space<vmem>>, vector<128x128xbf16>
    %c2 = arith.constant 2 : index
    %c0_11 = arith.constant 0 : index
    %18 = vector.load %arg3[%c2, %c0_11] : memref<3x128xf32, #tpu.memory_space<vmem>>, vector<1x128xf32>
    %19 = arith.truncf %16 : vector<8x128xf32> to vector<8x128xbf16>
    %cst_12 = arith.constant dense<0.000000e+00> : vector<8x128xf32>
    %20 = tpu.matmul %19, %17, %cst_12 {dimension_numbers = #tpu.dot_dimension_numbers<[1], [0], [0], [1], [0, 0, 1, 1], [], []>} : vector<8x128xbf16>, vector<128x128xbf16>, vector<8x128xf32> -> vector<8x128xf32>
    %21 = vector.broadcast %18 : vector<1x128xf32> to vector<8x128xf32>
    %22 = arith.addf %20, %21 : vector<8x128xf32>
    %23 = vector.extract_strided_slice %22 {offsets = [0, 0], sizes = [8, 16], strides = [1, 1]} : vector<8x128xf32> to vector<8x16xf32>
    %c0_13 = arith.constant 0 : index
    %c0_14 = arith.constant 0 : index
    %24 = vector.load %arg4[%c0_13, %c0_14] : memref<8x16xf32, #tpu.memory_space<vmem>>, vector<8x16xf32>
    tpu.vector_store %arg4[%c0_13, %c0_14], %23 {strides = array<i32>} : memref<8x16xf32, #tpu.memory_space<vmem>>, vector<8x16xf32>,
    return
  }
  func.func @transform_0(%arg0: i32) -> (i32, i32) {
    %c0_i32 = arith.constant 0 : i32
    %c0_i32_0 = arith.constant 0 : i32
    return %arg0, %c0_i32 : i32, i32
  }
  func.func @transform_1(%arg0: i32) -> (i32, i32) {
    %c0_i32 = arith.constant 0 : i32
    %c0_i32_0 = arith.constant 0 : i32
    %c0_i32_1 = arith.constant 0 : i32
    return %c0_i32, %c0_i32_0 : i32, i32
  }
  func.func @transform_2(%arg0: i32) -> (i32, i32) {
    %c0_i32 = arith.constant 0 : i32
    %c0_i32_0 = arith.constant 0 : i32
    %c0_i32_1 = arith.constant 0 : i32
    return %c0_i32, %c0_i32_0 : i32, i32
  }
  func.func @transform_3(%arg0: i32) -> (i32, i32) {
    %c0_i32 = arith.constant 0 : i32
    %c0_i32_0 = arith.constant 0 : i32
    return %arg0, %c0_i32 : i32, i32
  }
}

</mosaic_0001>

<bundles_post_ra>
// kernel: tpu_custom_call.1
= control target key start
LH: loop header
LB: loop body
LE: loop exit
PB: predicated region body
PF: predicated region fallthrough
CT: control target
= control target key end

     0   :  { %8 = vsyncpa [#allocation3], 0  ;;  %s518_s0 = inlined_call_operand.hbm [shape: f32[8,32], index: 0, kind: input, shape index: {}]   ;;  %s519_s1 = inlined_call_operand.hbm [shape: bf16[288,128], index: 1, kind: input, shape index: {}]   ;;  %s520_s2 = inlined_call_operand.hbm [shape: f32[3,128], index: 2, kind: input, shape index: {}]   ;;  %s521_s3 = inlined_call_operand.hbm [shape: f32[8,16], index: 3, kind: output, shape index: {}]  }
   0x1   :  { %9 = vsyncpa [#allocation6], 0  ;;  %s26_s14 = sshll.u32 %s519_s1, 4  ;;  %s27_s14 = int_to_ptr.hbm [resolvable:$true] %s26_s14 }
   0x2   :  { %10 = vsyncpa [#allocation4], 0  ;;  %s480_s15 = smov [#allocation5]   ;;  %s16_s19 = sshll.u32 %s518_s0, 4  ;;  %s17_s19 = int_to_ptr.hbm [resolvable:$true] %s16_s19 }
   0x3   :  { %s28_s16 = sshll.u32 %s480_s15, 4  ;;  %s481_s20 = smov 64   ;;  %s29_s16 = int_to_ptr.vmem [resolvable:$true] %s28_s16 }
   0x4   :  { %s482_s21 = smov 4   ;;  %s483_s22 = smov [#allocation2]  }
   0x5   :  { %34 = dma.hbm_to_vmem [thread:$0]  %s27_s14, 2304, %s29_s16, [#allocation6], %s481_s20, %s481_s20, %s482_s21  }
   0x6   :  { %s18_s23 = sshll.u32 %s483_s22, 4  ;;  %s40_s26 = sshll.u32 %s520_s2, 4  ;;  %s19_s23 = int_to_ptr.vmem [resolvable:$true] %s18_s23  ;;  %s41_s26 = int_to_ptr.hbm [resolvable:$true] %s40_s26 }
   0x7   :  { %21 = dma.hbm_to_vmem [thread:$0]  %s17_s19, 128, %s19_s23, [#allocation3]  }
   0x8   :  { %s484_s1 = smov [#allocation7]  }
   0x9   :  { %s42_s27 = sshll.u32 %s484_s1, 4  ;;  %s43_s27 = int_to_ptr.vmem [resolvable:$true] %s42_s27 }
   0xa   :  { %45 = dma.hbm_to_vmem [thread:$0]  %s41_s26, 64, %s43_s27, [#allocation6]  }
   0xb   :  { %474 = dma.done.wait [#allocation3], 128  }
   0xc   :  { %475 = vsyncadd [#allocation3], 4294967168 }
   0xd   :  { %476 = dma.done.wait [#allocation6], 2368  }
   0xe   :  { %477 = vsyncadd [#allocation6], 4294964928  ;;  %v352_v0 = vld [vmem:[#allocation5 + $0x8] sm:$0xff]  ;;  %v351_v2 = vld [vmem:[#allocation5] sm:$0xff]  ;;  %vm79_vm0 = vcmask 261120   ;;  %s485_s0 = smov [#allocation8]  }
   0xf   :  { %v360_v1 = vld [vmem:[#allocation5 + $0x48] sm:$0xff]  ;;  %89 = vmatpush.bf16.msra.mxu0 %v352_v0  ;;  %v59_v3 = vld [vmem:[#allocation2] sm:$0xff]  ;;  %v359_v4 = vld [vmem:[#allocation5 + $0x40] sm:$0xff]  ;;  %s265_s2 = sshll.u32 %s485_s0, 4  ;;  %s267_s30 = sshll.u32 %s521_s3, 4  ;;  %vm258_vm1 = vcmask 130048   ;;  %s266_s2 = int_to_ptr.vmem [resolvable:$true] %s265_s2  ;;  %s268_s30 = int_to_ptr.hbm [resolvable:$true] %s267_s30 }
  0x10   :  { %164 = vmatpush.bf16.msra.mxu1 %v360_v1  ;;  %v65_v5 = vpack.c.bf16 %v59_v3, %v59_v3  ;;  %v358_v6 = vld [vmem:[#allocation5 + $0x38] sm:$0xff]  ;;  %v357_v7 = vld [vmem:[#allocation5 + $0x30] sm:$0xff]  ;;  %v356_v8 = vld [vmem:[#allocation5 + $0x28] sm:$0xff] }
  0x11   :  { %v355_v9 = vld [vmem:[#allocation5 + $0x20] sm:$0xff]  ;;  %v354_v10 = vld [vmem:[#allocation5 + $0x18] sm:$0xff]  ;;  %v353_v11 = vld [vmem:[#allocation5 + $0x10] sm:$0xff] }
  0x12   :  { %v368_v12 = vld [vmem:[#allocation5 + $0x88] sm:$0xff]  ;;  %v367_v13 = vld [vmem:[#allocation5 + $0x80] sm:$0xff]  ;;  %v366_v14 = vld [vmem:[#allocation5 + $0x78] sm:$0xff] }
  0x13   :  { %90 = vmatpush.bf16.msra.mxu0 %v351_v2  ;;  %245 = vmatpush.bf16.msra.mxu2 %v368_v12  ;;  %v365_v15 = vld [vmem:[#allocation5 + $0x70] sm:$0xff]  ;;  %v364_v16 = vld [vmem:[#allocation5 + $0x68] sm:$0xff]  ;;  %v363_v17 = vld [vmem:[#allocation5 + $0x60] sm:$0xff] }
  0x14   :  { %165 = vmatpush.bf16.msra.mxu1 %v359_v4  ;;  %v375_v18 = vld [vmem:[#allocation7] ss:$0 sm:$0xff]  ;;  %v362_v24 = vld [vmem:[#allocation5 + $0x58] sm:$0xff]  ;;  %v376_v26 = vld [vmem:[#allocation7 + $0x1] ss:$0 sm:$0xff] }
  0x15   :  { %v361_v25 = vld [vmem:[#allocation5 + $0x50] sm:$0xff] }
  0x16   :  { %286 = vmatmul.msk.bf16.vlgmr.msra.gmra.mxu0 %vm79_vm0, %v65_v5  ;;  %v377_v32 = vld [vmem:[#allocation7 + $0x2] ss:$0 sm:$0xff] }
  0x17   :  { %246 = vmatpush.bf16.msra.mxu2 %v367_v13 }
  0x18   :  { %166 = vmatpush.bf16.msra.mxu1 %v358_v6 }
  0x1b   :  { %247 = vmatpush.bf16.msra.mxu2 %v366_v14 }
  0x1c   :  { %167 = vmatpush.bf16.msra.mxu1 %v357_v7 }
  0x1f   :  { %248 = vmatpush.bf16.msra.mxu2 %v365_v15 }
  0x20   :  { %168 = vmatpush.bf16.msra.mxu1 %v356_v8 }
  0x23   :  { %249 = vmatpush.bf16.msra.mxu2 %v364_v16 }
  0x24   :  { %169 = vmatpush.bf16.msra.mxu1 %v355_v9 }
  0x27   :  { %250 = vmatpush.bf16.msra.mxu2 %v363_v17 }
  0x28   :  { %170 = vmatpush.bf16.msra.mxu1 %v354_v10 }
  0x2b   :  { %251 = vmatpush.bf16.msra.mxu2 %v362_v24 }
  0x2c   :  { %171 = vmatpush.bf16.msra.mxu1 %v353_v11 }
  0x2f   :  { %252 = vmatpush.bf16.msra.mxu2 %v361_v25 }
  0x93   :  { %v92_v19 = vpop.f32.mrf.mxu0 }
  0x94   :  { %v93_v20 = vadd.f32 %v375_v18, %v92_v19 }
  0x96   :  { %v96_v21 = vmax.f32 %v93_v20, 0.0 }
  0x98   :  { %v114_v22 = vpack.c.bf16 %v96_v21, %v96_v21 }
  0x9a   :  { %172 = vmatmul.bf16.vlgmr.msra.gmra.mxu1 %v114_v22 }
  0x9b   :  { %v94_v23 = vpop.f32.mrf.mxu0 }
 0x117   :  { %v173_v27 = vpop.f32.mrf.mxu1 }
 0x118   :  { %v174_v28 = vadd.f32 %v376_v26, %v173_v27 }
 0x11a   :  { %v177_v29 = vmax.f32 %v174_v28, 0.0 }
 0x11c   :  { %v195_v30 = vpack.c.bf16 %v177_v29, %v177_v29 }
 0x11e   :  { %253 = vmatmul.bf16.vlgmr.msra.gmra.mxu2 %v195_v30 }
 0x11f   :  { %v175_v31 = vpop.f32.mrf.mxu1 }
 0x1a1   :  { %v254_v33 = vpop.f32.mrf.mxu2 }
 0x1a2   :  { %v255_v34 = vadd.f32 %v377_v32, %v254_v33 }
 0x1a4   :  { %259 = vst.msk [vmem:[#allocation8] sm:$0xff] %vm258_vm1, %v255_v34 }
 0x1a5   :  { %270 = dma.vmem_to_hbm [thread:$0]  %s266_s2, 128, %s268_s30, [#allocation4]  }
 0x1a9   :  { %v256_v35 = vpop.f32.mrf.mxu2 }
 0x1aa   :  { %478 = dma.done.wait [#allocation4], 128  }
 0x1ab   :  { %479 = vsyncadd [#allocation4], 4294967168 }
 0x1ac   :  { %275 = vsyncpa [#allocation3], 1 }
 0x1ad   :  { %276 = vsyncpa [#allocation6], 1 }
 0x1ae   :  { %277 = vsyncpa [#allocation4], 1 }

</bundles_post_ra>
